<compile_context>
chip_gen: v6e
topology: v6e:2x2x1
jax: 0.10.0
libtpu: 0.0.40
codegen_flags: <defaults>
</compile_context>

<pallas_src>
import jax
import jax.numpy as jnp
from jax.experimental import pallas as pl
from jax.experimental.pallas import tpu as pltpu


def _round_up(n, m):
    return ((n + m - 1) // m) * m


def _cdiv(a, b):
    return (a + b - 1) // b


def _mlp_kernel(x_ref, w1_ref, b1_ref, w2_ref, b2_ref, o_ref, h_ref):
    # x_ref : (TB, Kin)  concat([x, loss], 1) tile, compute dtype
    # w1_ref: (Kin, Hp)  VMEM-resident first-layer weight (loss row included)
    # b1_ref: (1, Hp) f32   w2_ref: (Hp, TN)   b2_ref: (1, TN) f32
    # o_ref : (TB, TN)  output tile, final dtype (lane-dense)
    # h_ref : (TB, Hp)  hidden-activation scratch (compute dtype), reused over j
    @pl.when(pl.program_id(1) == 0)
    def _():
        # Hidden layer once per batch tile; reused across all output (j) tiles.
        h = jnp.dot(x_ref[...], w1_ref[...], preferred_element_type=jnp.float32)
        h = jnp.maximum(h + b1_ref[...], 0.0)   # bias + ReLU in f32 (v5e-safe VPU)
        h_ref[...] = h.astype(h_ref.dtype)

    y = jnp.dot(h_ref[...], w2_ref[...], preferred_element_type=jnp.float32)
    o_ref[...] = (y + b2_ref[...]).astype(o_ref.dtype)


def prepare_mlp_params(w1, b1, w2, b2, *, compute_dtype=jnp.bfloat16):
    """Pad/cast the weights ONCE, outside the per-call hot path.

    w1: (in_dim + 1, hidden)  transposed nn.Linear weight; the last row is the
        loss column, so cat([x, loss], 1) @ w1 == the PyTorch Linear on the concat.
    b1: (hidden,) or (1, hidden);  w2: (hidden, out_dim);  b2: (out_dim,) / (1, out_dim)
    compute_dtype: MXU operand dtype (bf16 default). Accumulation/bias/ReLU are f32.
    """
    cdt = jnp.dtype(compute_dtype)
    w1 = jnp.asarray(w1)
    w2 = jnp.asarray(w2)
    kin, hidden = w1.shape
    out_dim = w2.shape[1]
    hp = _round_up(hidden, 128)
    np_ = _round_up(out_dim, 128)
    w1p = jnp.zeros((kin, hp), cdt).at[:, :hidden].set(w1.astype(cdt))
    b1p = jnp.zeros((1, hp), jnp.float32).at[:, :hidden].set(
        jnp.asarray(b1).reshape(1, -1).astype(jnp.float32))
    w2p = jnp.zeros((hp, np_), cdt).at[:hidden, :out_dim].set(w2.astype(cdt))
    b2p = jnp.zeros((1, np_), jnp.float32).at[:, :out_dim].set(
        jnp.asarray(b2).reshape(1, -1).astype(jnp.float32))
    return dict(w1=w1p, b1=b1p, w2=w2p, b2=b2p,
                in_dim=kin - 1, hidden=hidden, out_dim=out_dim,
                compute_dtype=cdt)


def mlp_forward(x, loss, params, *, block_b=256):
    """Equivalent of MLP.forward(x, loss) using pre-prepared (padded) params."""
    B, in_dim = x.shape
    assert in_dim == params["in_dim"], "x feature dim does not match params"
    assert loss.shape == (B, 1)
    cdt = params["compute_dtype"]
    cb = cdt.itemsize
    out_dtype = x.dtype
    ob = jnp.dtype(out_dtype).itemsize
    Kin = in_dim + 1
    Hp = params["w1"].shape[1]
    Np = params["w2"].shape[1]
    out_dim = params["out_dim"]
    sub = {4: 8, 2: 16, 1: 32}.get(cb, 8)

    # Fused concat: loss is just the last input feature (rides the MXU via the
    # last row of W1). Only a small (Bp, in_dim+1) buffer is built per call; K is
    # NOT padded to 128 (full-dim BlockSpec exception). Batch is padded to the
    # sublane multiple with zeros; any partial last tile beyond Bp only produces
    # rows that are masked away on the output writeback (benign by construction).
    Bp = _round_up(B, sub)
    xin = jnp.zeros((Bp, Kin), cdt)
    xin = xin.at[:B, :in_dim].set(x.astype(cdt)).at[:B, in_dim:].set(loss.astype(cdt))

    # Batch tile: keep >= ~4 grid steps for large batches so the DMA pipeline has
    # work to overlap and the 'parallel' axis can shard across v7x's 2 TensorCores.
    TB = max(sub, min(_round_up(block_b, sub),
                      _round_up(max(_cdiv(Bp, 4), 1), sub),
                      Bp))

    # Generation-aware VMEM budget (leave ~16 MiB headroom for Mosaic scratch).
    try:
        phys_vmem = int(pltpu.get_tpu_info().vmem_capacity_bytes)
    except Exception:
        phys_vmem = 64 * 1024 * 1024      # v7x per-TC size: safe lower bound
    budget = max(phys_vmem - (16 << 20), 16 << 20)

    def vmem_est(tb, tn, single_buf):
        w_buf = 1 if single_buf else 2
        w2_buf = w_buf if tn == Np else 2              # streamed W2 double-buffers
        return (Kin * Hp * cb * w_buf + Hp * 4 * w_buf         # W1, b1 resident
                + Hp * tn * cb * w2_buf + tn * 4 * w2_buf      # W2, b2 block(s)
                + 2 * tb * Kin * cb                            # x tile (dbl-buf)
                + 2 * tb * tn * ob                             # out tile (dbl-buf)
                + tb * Hp * cb                                 # h scratch
                + tb * Hp * 4 + tb * tn * 4)                   # f32 temporaries

    # Tile the output/N axis (streams W2, reuses h) before shrinking the batch tile.
    TN = Np
    while TN > 128 and vmem_est(TB, TN, True) > budget:
        TN = max(128, (TN // 2) // 128 * 128)
    while TB > sub and vmem_est(TB, TN, True) > budget:
        TB = max(sub, _round_up(TB // 2, sub))

    grid = (_cdiv(Bp, TB), _cdiv(Np, TN))
    vmem_limit = int(budget) if vmem_est(TB, TN, True) > (16 << 20) else None

    def run(single_buffer_weights):
        # Single-buffer the VMEM-resident (constant index_map) weights/biases.
        const = (dict(pipeline_mode=pl.Buffered(1)) if single_buffer_weights else {})
        w2_const = const if grid[1] == 1 else {}
        return pl.pallas_call(
            _mlp_kernel,
            out_shape=jax.ShapeDtypeStruct((Bp, Np), out_dtype),
            grid_spec=pltpu.PrefetchScalarGridSpec(
                num_scalar_prefetch=0,
                grid=grid,
                in_specs=[
                    pl.BlockSpec((TB, Kin), lambda i, j: (i, 0)),            # x tile
                    pl.BlockSpec((Kin, Hp), lambda i, j: (0, 0), **const),   # W1
                    pl.BlockSpec((1, Hp), lambda i, j: (0, 0), **const),     # b1
                    pl.BlockSpec((Hp, TN), lambda i, j: (0, j), **w2_const), # W2
                    pl.BlockSpec((1, TN), lambda i, j: (0, j), **w2_const),  # b2
                ],
                out_specs=pl.BlockSpec((TB, TN), lambda i, j: (i, j)),
                scratch_shapes=[pltpu.VMEM((TB, Hp), cdt)],                  # h
            ),
            compiler_params=pltpu.CompilerParams(
                dimension_semantics=("parallel", "arbitrary"),
                vmem_limit_bytes=vmem_limit,
            ),
        )(xin, params["w1"], params["b1"], params["w2"], params["b2"])

    try:
        out = run(True)
    except Exception:
        # Fallback if this JAX build rejects pipeline_mode=pl.Buffered(1).
        out = run(False)

    # Padded rows/cols were zero-filled and the output is already in out_dtype,
    # so this is a pure slice (no extra astype round trip).
    return out[:B, :out_dim]


def init_mlp_params(key, in_dim, out_dim, hidden_dim, dtype=jnp.float32):
    """Deterministic init mirroring nn.Linear's U(-1/sqrt(fan_in), 1/sqrt(fan_in)).

    Weights are stored transposed (in, out) so the kernel does plain x @ W + b.
    """
    k1, k2, k3, k4 = jax.random.split(key, 4)
    fan1 = in_dim + 1
    bound1 = 1.0 / jnp.sqrt(fan1)
    w1 = jax.random.uniform(k1, (fan1, hidden_dim), dtype, -bound1, bound1)
    b1 = jax.random.uniform(k2, (1, hidden_dim), dtype, -bound1, bound1)
    fan2 = hidden_dim
    bound2 = 1.0 / jnp.sqrt(fan2)
    w2 = jax.random.uniform(k3, (fan2, out_dim), dtype, -bound2, bound2)
    b2 = jax.random.uniform(k4, (1, out_dim), dtype, -bound2, bound2)
    return w1, b1, w2, b2


if __name__ == "__main__":
    key = jax.random.PRNGKey(0)
    kx, kl, kp = jax.random.split(key, 3)

    batch, in_dim, out_dim, hidden_dim = 2, 4, 4, 32

    x = jax.random.normal(kx, (batch, in_dim), jnp.float32)
    loss = jax.random.normal(kl, (batch, 1), jnp.float32)
    w1, b1, w2, b2 = init_mlp_params(kp, in_dim, out_dim, hidden_dim)

    # Pure-JAX reference of the same math (the torch module's forward).
    xin = jnp.concatenate([x, loss], axis=1)
    ref = jnp.maximum(xin @ w1 + b1, 0.0) @ w2 + b2

    # f32-operand path (tight check).
    params_f32 = prepare_mlp_params(w1, b1, w2, b2, compute_dtype=jnp.float32)
    out = mlp_forward(x, loss, params_f32)
    jax.block_until_ready(out)
    assert out.shape == (batch, out_dim)
    assert out.dtype == x.dtype
    assert jnp.allclose(out, ref, atol=1e-5, rtol=1e-5), "f32 mismatch vs reference"

    # bf16-operand / f32-accumulate path (default; loose tolerance).
    params_bf16 = prepare_mlp_params(w1, b1, w2, b2)   # compute_dtype=bfloat16
    out_bf16 = mlp_forward(x, loss, params_bf16)
    jax.block_until_ready(out_bf16)
    assert out_bf16.shape == (batch, out_dim)
    assert jnp.allclose(out_bf16, ref, atol=0.15, rtol=0.15), "bf16 mismatch vs reference"

    print("KERNEL_OK")
</pallas_src>

<mosaic_0001>
module attributes {stable_mosaic.version = 11 : i64} {
  func.func @_mlp_kernel(%arg0: i32, %arg1: i32, %arg2: memref<8x5xf32, #tpu.memory_space<vmem>>, %arg3: memref<5x128xf32, #tpu.memory_space<vmem>>, %arg4: memref<1x128xf32, #tpu.memory_space<vmem>>, %arg5: memref<128x128xf32, #tpu.memory_space<vmem>>, %arg6: memref<1x128xf32, #tpu.memory_space<vmem>>, %arg7: memref<8x128xf32, #tpu.memory_space<vmem>>, %arg8: memref<8x128xf32, #tpu.memory_space<vmem>>) attributes {dimension_semantics = [#tpu.dimension_semantics<parallel>, #tpu.dimension_semantics<arbitrary>], iteration_bounds = array<i64: 1, 1>, scalar_prefetch = 0 : i64, scratch_operands = 1 : i64, tpu.core_type = #tpu.core_type<tc>, window_params = [{transform_indices = @transform_0, window_bounds = array<i64: 8, 5>}, {pipeline_mode = #tpu.pipeline_mode<synchronous>, transform_indices = @transform_1, window_bounds = array<i64: 5, 128>}, {pipeline_mode = #tpu.pipeline_mode<synchronous>, transform_indices = @transform_2, window_bounds = array<i64: 1, 128>}, {pipeline_mode = #tpu.pipeline_mode<synchronous>, transform_indices = @transform_3, window_bounds = array<i64: 128, 128>}, {pipeline_mode = #tpu.pipeline_mode<synchronous>, transform_indices = @transform_4, window_bounds = array<i64: 1, 128>}, {transform_indices = @transform_5, window_bounds = array<i64: 8, 128>}]} {
    %c0_i32 = arith.constant 0 : i32
    %0 = arith.cmpi eq, %arg1, %c0_i32 : i32
    %1 = arith.extui %0 : i1 to i32
    %c0_i32_0 = arith.constant 0 : i32
    %2 = arith.cmpi ne, %1, %c0_i32_0 : i32
    scf.if %2 {
      %c0_8 = arith.constant 0 : index
      %c0_9 = arith.constant 0 : index
      %10 = vector.load %arg2[%c0_8, %c0_9] : memref<8x5xf32, #tpu.memory_space<vmem>>, vector<8x5xf32>
      %c0_10 = arith.constant 0 : index
      %c0_11 = arith.constant 0 : index
      %11 = vector.load %arg3[%c0_10, %c0_11] : memref<5x128xf32, #tpu.memory_space<vmem>>, vector<5x128xf32>
      %cst_12 = arith.constant dense<0.000000e+00> : vector<8x128xf32>
      %12 = tpu.matmul %10, %11, %cst_12 {dimension_numbers = #tpu.dot_dimension_numbers<[1], [0], [0], [1], [0, 0, 1, 1], [], []>} : vector<8x5xf32>, vector<5x128xf32>, vector<8x128xf32> -> vector<8x128xf32>
      %c0_13 = arith.constant 0 : index
      %c0_14 = arith.constant 0 : index
      %13 = vector.load %arg4[%c0_13, %c0_14] : memref<1x128xf32, #tpu.memory_space<vmem>>, vector<1x128xf32>
      %14 = vector.broadcast %13 : vector<1x128xf32> to vector<8x128xf32>
      %15 = arith.addf %12, %14 : vector<8x128xf32>
      %cst_15 = arith.constant 0.000000e+00 : f32
      %16 = vector.broadcast %cst_15 : f32 to vector<8x128xf32>
      %17 = arith.maximumf %15, %16 : vector<8x128xf32>
      %c0_16 = arith.constant 0 : index
      %c0_17 = arith.constant 0 : index
      %18 = vector.load %arg8[%c0_16, %c0_17] : memref<8x128xf32, #tpu.memory_space<vmem>>, vector<8x128xf32>
      tpu.vector_store %arg8[%c0_16, %c0_17], %17 {strides = array<i32>} : memref<8x128xf32, #tpu.memory_space<vmem>>, vector<8x128xf32>,
    } else {
    }
    %c0 = arith.constant 0 : index
    %c0_1 = arith.constant 0 : index
    %3 = vector.load %arg8[%c0, %c0_1] : memref<8x128xf32, #tpu.memory_space<vmem>>, vector<8x128xf32>
    %c0_2 = arith.constant 0 : index
    %c0_3 = arith.constant 0 : index
    %4 = vector.load %arg5[%c0_2, %c0_3] : memref<128x128xf32, #tpu.memory_space<vmem>>, vector<128x128xf32>
    %cst = arith.constant dense<0.000000e+00> : vector<8x128xf32>
    %5 = tpu.matmul %3, %4, %cst {dimension_numbers = #tpu.dot_dimension_numbers<[1], [0], [0], [1], [0, 0, 1, 1], [], []>} : vector<8x128xf32>, vector<128x128xf32>, vector<8x128xf32> -> vector<8x128xf32>
    %c0_4 = arith.constant 0 : index
    %c0_5 = arith.constant 0 : index
    %6 = vector.load %arg6[%c0_4, %c0_5] : memref<1x128xf32, #tpu.memory_space<vmem>>, vector<1x128xf32>
    %7 = vector.broadcast %6 : vector<1x128xf32> to vector<8x128xf32>
    %8 = arith.addf %5, %7 : vector<8x128xf32>
    %c0_6 = arith.constant 0 : index
    %c0_7 = arith.constant 0 : index
    %9 = vector.load %arg7[%c0_6, %c0_7] : memref<8x128xf32, #tpu.memory_space<vmem>>, vector<8x128xf32>
    tpu.vector_store %arg7[%c0_6, %c0_7], %8 {strides = array<i32>} : memref<8x128xf32, #tpu.memory_space<vmem>>, vector<8x128xf32>,
    return
  }
  func.func @transform_0(%arg0: i32, %arg1: i32) -> (i32, i32) {
    %c0_i32 = arith.constant 0 : i32
    %c0_i32_0 = arith.constant 0 : i32
    return %arg0, %c0_i32 : i32, i32
  }
  func.func @transform_1(%arg0: i32, %arg1: i32) -> (i32, i32) {
    %c0_i32 = arith.constant 0 : i32
    %c0_i32_0 = arith.constant 0 : i32
    %c0_i32_1 = arith.constant 0 : i32
    return %c0_i32, %c0_i32_0 : i32, i32
  }
  func.func @transform_2(%arg0: i32, %arg1: i32) -> (i32, i32) {
    %c0_i32 = arith.constant 0 : i32
    %c0_i32_0 = arith.constant 0 : i32
    %c0_i32_1 = arith.constant 0 : i32
    return %c0_i32, %c0_i32_0 : i32, i32
  }
  func.func @transform_3(%arg0: i32, %arg1: i32) -> (i32, i32) {
    %c0_i32 = arith.constant 0 : i32
    %c0_i32_0 = arith.constant 0 : i32
    return %c0_i32, %arg1 : i32, i32
  }
  func.func @transform_4(%arg0: i32, %arg1: i32) -> (i32, i32) {
    %c0_i32 = arith.constant 0 : i32
    %c0_i32_0 = arith.constant 0 : i32
    return %c0_i32, %arg1 : i32, i32
  }
  func.func @transform_5(%arg0: i32, %arg1: i32) -> (i32, i32) {
    %c0_i32 = arith.constant 0 : i32
    return %arg0, %arg1 : i32, i32
  }
}

module attributes {stable_mosaic.version = 11 : i64} {
  func.func @_mlp_kernel(%arg0: i32, %arg1: i32, %arg2: memref<8x5xf32, #tpu.memory_space<vmem>>, %arg3: memref<5x128xf32, #tpu.memory_space<vmem>>, %arg4: memref<1x128xf32, #tpu.memory_space<vmem>>, %arg5: memref<128x128xf32, #tpu.memory_space<vmem>>, %arg6: memref<1x128xf32, #tpu.memory_space<vmem>>, %arg7: memref<8x128xf32, #tpu.memory_space<vmem>>, %arg8: memref<8x128xf32, #tpu.memory_space<vmem>>) attributes {dimension_semantics = [#tpu.dimension_semantics<parallel>, #tpu.dimension_semantics<arbitrary>], iteration_bounds = array<i64: 1, 1>, scalar_prefetch = 0 : i64, scratch_operands = 1 : i64, tpu.core_type = #tpu.core_type<tc>, window_params = [{transform_indices = @transform_0, window_bounds = array<i64: 8, 5>}, {pipeline_mode = #tpu.pipeline_mode<synchronous>, transform_indices = @transform_1, window_bounds = array<i64: 5, 128>}, {pipeline_mode = #tpu.pipeline_mode<synchronous>, transform_indices = @transform_2, window_bounds = array<i64: 1, 128>}, {transform_indices = @transform_3, window_bounds = array<i64: 128, 128>}, {transform_indices = @transform_4, window_bounds = array<i64: 1, 128>}, {transform_indices = @transform_5, window_bounds = array<i64: 8, 128>}]} {
    %c0_i32 = arith.constant 0 : i32
    %0 = arith.cmpi eq, %arg1, %c0_i32 : i32
    %1 = arith.extui %0 : i1 to i32
    %c0_i32_0 = arith.constant 0 : i32
    %2 = arith.cmpi ne, %1, %c0_i32_0 : i32
    scf.if %2 {
      %c0_8 = arith.constant 0 : index
      %c0_9 = arith.constant 0 : index
      %10 = vector.load %arg2[%c0_8, %c0_9] : memref<8x5xf32, #tpu.memory_space<vmem>>, vector<8x5xf32>
      %c0_10 = arith.constant 0 : index
      %c0_11 = arith.constant 0 : index
      %11 = vector.load %arg3[%c0_10, %c0_11] : memref<5x128xf32, #tpu.memory_space<vmem>>, vector<5x128xf32>
      %cst_12 = arith.constant dense<0.000000e+00> : vector<8x128xf32>
      %12 = tpu.matmul %10, %11, %cst_12 {dimension_numbers = #tpu.dot_dimension_numbers<[1], [0], [0], [1], [0, 0, 1, 1], [], []>} : vector<8x5xf32>, vector<5x128xf32>, vector<8x128xf32> -> vector<8x128xf32>
      %c0_13 = arith.constant 0 : index
      %c0_14 = arith.constant 0 : index
      %13 = vector.load %arg4[%c0_13, %c0_14] : memref<1x128xf32, #tpu.memory_space<vmem>>, vector<1x128xf32>
      %14 = vector.broadcast %13 : vector<1x128xf32> to vector<8x128xf32>
      %15 = arith.addf %12, %14 : vector<8x128xf32>
      %cst_15 = arith.constant 0.000000e+00 : f32
      %16 = vector.broadcast %cst_15 : f32 to vector<8x128xf32>
      %17 = arith.maximumf %15, %16 : vector<8x128xf32>
      %c0_16 = arith.constant 0 : index
      %c0_17 = arith.constant 0 : index
      %18 = vector.load %arg8[%c0_16, %c0_17] : memref<8x128xf32, #tpu.memory_space<vmem>>, vector<8x128xf32>
      tpu.vector_store %arg8[%c0_16, %c0_17], %17 {strides = array<i32>} : memref<8x128xf32, #tpu.memory_space<vmem>>, vector<8x128xf32>,
    } else {
    }
    %c0 = arith.constant 0 : index
    %c0_1 = arith.constant 0 : index
    %3 = vector.load %arg8[%c0, %c0_1] : memref<8x128xf32, #tpu.memory_space<vmem>>, vector<8x128xf32>
    %c0_2 = arith.constant 0 : index
    %c0_3 = arith.constant 0 : index
    %4 = vector.load %arg5[%c0_2, %c0_3] : memref<128x128xf32, #tpu.memory_space<vmem>>, vector<128x128xf32>
    %cst = arith.constant dense<0.000000e+00> : vector<8x128xf32>
    %5 = tpu.matmul %3, %4, %cst {dimension_numbers = #tpu.dot_dimension_numbers<[1], [0], [0], [1], [0, 0, 1, 1], [], []>} : vector<8x128xf32>, vector<128x128xf32>, vector<8x128xf32> -> vector<8x128xf32>
    %c0_4 = arith.constant 0 : index
    %c0_5 = arith.constant 0 : index
    %6 = vector.load %arg6[%c0_4, %c0_5] : memref<1x128xf32, #tpu.memory_space<vmem>>, vector<1x128xf32>
    %7 = vector.broadcast %6 : vector<1x128xf32> to vector<8x128xf32>
    %8 = arith.addf %5, %7 : vector<8x128xf32>
    %c0_6 = arith.constant 0 : index
    %c0_7 = arith.constant 0 : index
    %9 = vector.load %arg7[%c0_6, %c0_7] : memref<8x128xf32, #tpu.memory_space<vmem>>, vector<8x128xf32>
    tpu.vector_store %arg7[%c0_6, %c0_7], %8 {strides = array<i32>} : memref<8x128xf32, #tpu.memory_space<vmem>>, vector<8x128xf32>,
    return
  }
  func.func @transform_0(%arg0: i32, %arg1: i32) -> (i32, i32) {
    %c0_i32 = arith.constant 0 : i32
    %c0_i32_0 = arith.constant 0 : i32
    return %arg0, %c0_i32 : i32, i32
  }
  func.func @transform_1(%arg0: i32, %arg1: i32) -> (i32, i32) {
    %c0_i32 = arith.constant 0 : i32
    %c0_i32_0 = arith.constant 0 : i32
    %c0_i32_1 = arith.constant 0 : i32
    return %c0_i32, %c0_i32_0 : i32, i32
  }
  func.func @transform_2(%arg0: i32, %arg1: i32) -> (i32, i32) {
    %c0_i32 = arith.constant 0 : i32
    %c0_i32_0 = arith.constant 0 : i32
    %c0_i32_1 = arith.constant 0 : i32
    return %c0_i32, %c0_i32_0 : i32, i32
  }
  func.func @transform_3(%arg0: i32, %arg1: i32) -> (i32, i32) {
    %c0_i32 = arith.constant 0 : i32
    %c0_i32_0 = arith.constant 0 : i32
    return %c0_i32, %arg1 : i32, i32
  }
  func.func @transform_4(%arg0: i32, %arg1: i32) -> (i32, i32) {
    %c0_i32 = arith.constant 0 : i32
    %c0_i32_0 = arith.constant 0 : i32
    return %c0_i32, %arg1 : i32, i32
  }
  func.func @transform_5(%arg0: i32, %arg1: i32) -> (i32, i32) {
    %c0_i32 = arith.constant 0 : i32
    return %arg0, %arg1 : i32, i32
  }
}

</mosaic_0001>

<bundles_post_ra>
// kernel: tpu_custom_call.1
= control target key start
LH: loop header
LB: loop body
LE: loop exit
PB: predicated region body
PF: predicated region fallthrough
CT: control target
= control target key end

     0   :  { %10 = vsyncpa [#allocation4], 0  ;;  %s475_s0 = inlined_call_operand.hbm [shape: f32[8,5], index: 0, kind: input, shape index: {}]   ;;  %s476_s1 = inlined_call_operand.hbm [shape: f32[5,128], index: 1, kind: input, shape index: {}]   ;;  %s477_s2 = inlined_call_operand.vmem [shape: f32[1,128], index: 2, kind: input, shape index: {}]   ;;  %s478_s3 = inlined_call_operand.hbm [shape: f32[128,128], index: 3, kind: input, shape index: {}]   ;;  %s479_s4 = inlined_call_operand.vmem [shape: f32[1,128], index: 4, kind: input, shape index: {}]   ;;  %s480_s5 = inlined_call_operand.hbm [shape: f32[8,128], index: 5, kind: output, shape index: {}]  }
   0x1   :  { %11 = vsyncpa [#allocation7], 0 }
   0x2   :  { %12 = vsyncpa [#allocation5], 0  ;;  %s419_s18 = smov [#allocation6]   ;;  %s420_s20 = smov [#allocation3]  }
   0x3   :  { %s29_s19 = sshll.u32 %s419_s18, 4  ;;  %s19_s21 = sshll.u32 %s420_s20, 4  ;;  %s30_s19 = int_to_ptr.vmem [resolvable:$true] %s29_s19  ;;  %s20_s21 = int_to_ptr.vmem [resolvable:$true] %s19_s21 }
   0x4   :  { %s341_s22 = scalar_lea.vmem %s30_s19, 128  ;;  %p346_p1 = scmp.lt.s32.totalorder %s30_s19, %s30_s19 }
   0x5   :  { %p342_p0 = scmp.ne.s32.totalorder %s30_s19, %s341_s22  ;;  %p347_p2 = scmp.lt.s32.totalorder %s341_s22, %s341_s22 }
   0x7   :  { %p348_p3 = por %p347_p2, %p346_p1 }
   0x9   :  { %p349_p4 = pnand %p348_p3, %p342_p0 }
   0xb   :  { %352 = shalt.err (!%p349_p4)
}
   0xc   :  { %32 = dma.hbm_to_vmem [thread:$0]  %s476_s1, 128, %s30_s19, [#allocation7]  }
   0xd   :  { %s361_s25 = scalar_lea.vmem %s20_s21, 128  ;;  %p366_p6 = scmp.lt.s32.totalorder %s20_s21, %s20_s21 }
   0xe   :  { %p362_p5 = scmp.ne.s32.totalorder %s20_s21, %s361_s25  ;;  %p367_p7 = scmp.lt.s32.totalorder %s361_s25, %s361_s25 }
  0x10   :  { %p368_p8 = por %p367_p7, %p366_p6 }
  0x12   :  { %p369_p9 = pnand %p368_p8, %p362_p5 }
  0x14   :  { %372 = shalt.err (!%p369_p9)
}
  0x15   :  { %22 = dma.hbm_to_vmem [thread:$0]  %s475_s0, 128, %s20_s21, [#allocation4]  }
  0x16   :  { %s421_s28 = smov [#allocation8]  }
  0x17   :  { %s40_s29 = sshll.u32 %s421_s28, 4  ;;  %s41_s29 = int_to_ptr.vmem [resolvable:$true] %s40_s29 }
  0x18   :  { %s381_s30 = scalar_lea.vmem %s41_s29, 2048  ;;  %p386_p11 = scmp.lt.s32.totalorder %s41_s29, %s41_s29 }
  0x19   :  { %p382_p10 = scmp.ne.s32.totalorder %s41_s29, %s381_s30  ;;  %p387_p12 = scmp.lt.s32.totalorder %s381_s30, %s381_s30 }
  0x1b   :  { %p388_p13 = por %p387_p12, %p386_p11 }
  0x1d   :  { %p389_p0 = pnand %p388_p13, %p382_p10 }
  0x1f   :  { %392 = shalt.err (!%p389_p0)
}
  0x20   :  { %s422_s1 = smov 128   ;;  %s423_s6 = smov 8  }
  0x21   :  { %46 = dma.hbm_to_vmem [thread:$0]  %s478_s3, 2048, %s41_s29, [#allocation7], %s422_s1, %s422_s1, %s423_s6  }
  0x22   :  { %413 = dma.done.wait [#allocation4], 128  }
  0x23   :  { %414 = vsyncadd [#allocation4], 4294967168 }
  0x24   :  { %415 = dma.done.wait [#allocation7], 2176  }
  0x25   :  { %416 = vsyncadd [#allocation7], 4294965120  ;;  %v424_v0 = vmov 0.0   ;;  %vm425_vm0 = vmmov 0   ;;  %vm75_vm1 = vcmask 1044480   ;;  %vm71_vm2 = vcmask 39936  }
  0x26   :  { %285 = vmatprep.subr.mxu0 %v424_v0  ;;  %287 = vmatprep.mubr.msk.f32.mxu0 %vm425_vm0, %v424_v0  ;;  %v63_v1 = vld [vmem:[#allocation6] sm:$0x1f]  ;;  %v62_v2 = vld [vmem:[#allocation3] sm:$0xff]  ;;  %v165_v5 = vld [vmem:[#allocation8 + $0x68] sm:$0xff]  ;;  %s426_s11 = smov [#allocation9]  }
  0x27   :  { %290 = vmatprep.subr.mxu1 %v424_v0  ;;  %322 = vmatprep.mubr.msk.f32.mxu1 %vm425_vm0, %v424_v0  ;;  %v167_v3 = vld [vmem:[#allocation8 + $0x78] sm:$0xff]  ;;  %v166_v4 = vld [vmem:[#allocation8 + $0x70] sm:$0xff]  ;;  %v164_v6 = vld [vmem:[#allocation8 + $0x60] sm:$0xff]  ;;  %s252_s12 = sshll.u32 %s426_s11, 4  ;;  %s253_s12 = int_to_ptr.vmem [resolvable:$true] %s252_s12 }
  0x28   :  { %286 = vmatpush3.msk.msra.mxu0 %vm75_vm1, %v63_v1  ;;  %291 = vmatpush3.msra.mxu1 %v167_v3  ;;  %v163_v7 = vld [vmem:[#allocation8 + $0x58] sm:$0xff]  ;;  %v162_v8 = vld [vmem:[#allocation8 + $0x50] sm:$0xff]  ;;  %v161_v9 = vld [vmem:[#allocation8 + $0x48] sm:$0xff]  ;;  %s393_s13 = scalar_lea.vmem %s253_s12, 128  ;;  %p398_p2 = scmp.lt.s32.totalorder %s253_s12, %s253_s12 }
  0x29   :  { %288 = vmatmul.mubr.msk.f32.vlgmr.msra.gmra.mxu0 %vm71_vm2, %v62_v2  ;;  %292 = vmatprep.subr.mxu1 %v424_v0  ;;  %v160_v10 = vld [vmem:[#allocation8 + $0x40] sm:$0xff]  ;;  %v159_v11 = vld [vmem:[#allocation8 + $0x38] sm:$0xff]  ;;  %v158_v12 = vld [vmem:[#allocation8 + $0x30] sm:$0xff]  ;;  %p394_p1 = scmp.ne.s32.totalorder %s253_s12, %s393_s13  ;;  %p399_p3 = scmp.lt.s32.totalorder %s393_s13, %s393_s13 }
  0x2a   :  { %293 = vmatpush3.msra.mxu1 %v166_v4  ;;  %v157_v13 = vld [vmem:[#allocation8 + $0x28] sm:$0xff]  ;;  %v156_v14 = vld [vmem:[#allocation8 + $0x20] sm:$0xff]  ;;  %v155_v15 = vld [vmem:[#allocation8 + $0x18] sm:$0xff] }
  0x2b   :  { %294 = vmatprep.subr.mxu1 %v424_v0  ;;  %v154_v16 = vld [vmem:[#allocation8 + $0x10] sm:$0xff]  ;;  %v153_v17 = vld [vmem:[#allocation8 + $0x8] sm:$0xff]  ;;  %v152_v18 = vld [vmem:[#allocation8] sm:$0xff]  ;;  %p400_p4 = por %p399_p3, %p398_p2 }
  0x2c   :  { %295 = vmatpush3.msra.mxu1 %v165_v5  ;;  %v262_v19 = vld [vmem:[%s477_s2] ss:$0 sm:$0xff] }
  0x2d   :  { %296 = vmatprep.subr.mxu1 %v424_v0  ;;  %v265_v24 = vld [vmem:[%s479_s4] ss:$0 sm:$0xff]  ;;  %p401_p5 = pnand %p400_p4, %p394_p1 }
  0x2e   :  { %297 = vmatpush3.msra.mxu1 %v164_v6 }
  0x2f   :  { %298 = vmatprep.subr.mxu1 %v424_v0 }
  0x30   :  { %299 = vmatpush3.msra.mxu1 %v163_v7 }
  0x31   :  { %300 = vmatprep.subr.mxu1 %v424_v0 }
  0x32   :  { %301 = vmatpush3.msra.mxu1 %v162_v8 }
  0x33   :  { %302 = vmatprep.subr.mxu1 %v424_v0 }
  0x34   :  { %303 = vmatpush3.msra.mxu1 %v161_v9 }
  0x35   :  { %304 = vmatprep.subr.mxu1 %v424_v0 }
  0x36   :  { %305 = vmatpush3.msra.mxu1 %v160_v10 }
  0x37   :  { %306 = vmatprep.subr.mxu1 %v424_v0 }
  0x38   :  { %307 = vmatpush3.msra.mxu1 %v159_v11 }
  0x39   :  { %308 = vmatprep.subr.mxu1 %v424_v0 }
  0x3a   :  { %309 = vmatpush3.msra.mxu1 %v158_v12 }
  0x3b   :  { %310 = vmatprep.subr.mxu1 %v424_v0 }
  0x3c   :  { %311 = vmatpush3.msra.mxu1 %v157_v13 }
  0x3d   :  { %312 = vmatprep.subr.mxu1 %v424_v0 }
  0x3e   :  { %313 = vmatpush3.msra.mxu1 %v156_v14 }
  0x3f   :  { %314 = vmatprep.subr.mxu1 %v424_v0 }
  0x40   :  { %315 = vmatpush3.msra.mxu1 %v155_v15 }
  0x41   :  { %316 = vmatprep.subr.mxu1 %v424_v0 }
  0x42   :  { %317 = vmatpush3.msra.mxu1 %v154_v16 }
  0x43   :  { %318 = vmatprep.subr.mxu1 %v424_v0 }
  0x44   :  { %319 = vmatpush3.msra.mxu1 %v153_v17 }
  0x45   :  { %320 = vmatprep.subr.mxu1 %v424_v0 }
  0x46   :  { %321 = vmatpush3.msra.mxu1 %v152_v18 }
  0xe9   :  { %v145_v20 = vpop.f32.mrf.mxu0 }
  0xea   :  { %v146_v21 = vadd.f32 %v262_v19, %v145_v20 }
  0xeb   :  { %v289_v22 = vpop.f32.mrf.mxu0 }
  0xec   :  { %v149_v23 = vmax.f32 %v146_v21, 0.0 }
  0xee   :  { %323 = vmatmul.mubr.f32.vlgmr.msra.gmra.mxu1 %v149_v23 }
 0x1ae   :  { %v241_v25 = vpop.f32.mrf.mxu1 }
 0x1af   :  { %v242_v26 = vadd.f32 %v265_v24, %v241_v25 }
 0x1b0   :  { %v324_v27 = vpop.f32.mrf.mxu1 }
 0x1b1   :  { %245 = vst [vmem:[#allocation9] sm:$0xff] %v242_v26 }
 0x1b2   :  { %404 = shalt.err (!%p401_p5)
}
 0x1b3   :  { %255 = dma.vmem_to_hbm [thread:$0]  %s253_s12, 128, %s480_s5, [#allocation5]  }
 0x1b4   :  { %417 = dma.done.wait [#allocation5], 128  }
 0x1b5   :  { %418 = vsyncadd [#allocation5], 4294967168 }
 0x1b6   :  { %259 = vsyncpa [#allocation4], 1 }
 0x1b7   :  { %260 = vsyncpa [#allocation7], 1 }
 0x1b8   :  { %261 = vsyncpa [#allocation5], 1 }

// kernel: tpu_custom_call.1
= control target key start
LH: loop header
LB: loop body
LE: loop exit
PB: predicated region body
PF: predicated region fallthrough
CT: control target
= control target key end

     0   :  { %10 = vsyncpa [#allocation4], 0  ;;  %s475_s0 = inlined_call_operand.hbm [shape: f32[8,5], index: 0, kind: input, shape index: {}]   ;;  %s476_s1 = inlined_call_operand.hbm [shape: f32[5,128], index: 1, kind: input, shape index: {}]   ;;  %s477_s2 = inlined_call_operand.vmem [shape: f32[1,128], index: 2, kind: input, shape index: {}]   ;;  %s478_s3 = inlined_call_operand.hbm [shape: f32[128,128], index: 3, kind: input, shape index: {}]   ;;  %s479_s4 = inlined_call_operand.vmem [shape: f32[1,128], index: 4, kind: input, shape index: {}]   ;;  %s480_s5 = inlined_call_operand.hbm [shape: f32[8,128], index: 5, kind: output, shape index: {}]  }
   0x1   :  { %11 = vsyncpa [#allocation7], 0 }
   0x2   :  { %12 = vsyncpa [#allocation5], 0  ;;  %s419_s18 = smov [#allocation6]   ;;  %s420_s20 = smov [#allocation3]  }
   0x3   :  { %s29_s19 = sshll.u32 %s419_s18, 4  ;;  %s19_s21 = sshll.u32 %s420_s20, 4  ;;  %s30_s19 = int_to_ptr.vmem [resolvable:$true] %s29_s19  ;;  %s20_s21 = int_to_ptr.vmem [resolvable:$true] %s19_s21 }
   0x4   :  { %s341_s22 = scalar_lea.vmem %s30_s19, 128  ;;  %p346_p1 = scmp.lt.s32.totalorder %s30_s19, %s30_s19 }
   0x5   :  { %p342_p0 = scmp.ne.s32.totalorder %s30_s19, %s341_s22  ;;  %p347_p2 = scmp.lt.s32.totalorder %s341_s22, %s341_s22 }
   0x7   :  { %p348_p3 = por %p347_p2, %p346_p1 }
   0x9   :  { %p349_p4 = pnand %p348_p3, %p342_p0 }
   0xb   :  { %352 = shalt.err (!%p349_p4)
}
   0xc   :  { %32 = dma.hbm_to_vmem [thread:$0]  %s476_s1, 128, %s30_s19, [#allocation7]  }
   0xd   :  { %s361_s25 = scalar_lea.vmem %s20_s21, 128  ;;  %p366_p6 = scmp.lt.s32.totalorder %s20_s21, %s20_s21 }
   0xe   :  { %p362_p5 = scmp.ne.s32.totalorder %s20_s21, %s361_s25  ;;  %p367_p7 = scmp.lt.s32.totalorder %s361_s25, %s361_s25 }
  0x10   :  { %p368_p8 = por %p367_p7, %p366_p6 }
  0x12   :  { %p369_p9 = pnand %p368_p8, %p362_p5 }
  0x14   :  { %372 = shalt.err (!%p369_p9)
}
  0x15   :  { %22 = dma.hbm_to_vmem [thread:$0]  %s475_s0, 128, %s20_s21, [#allocation4]  }
  0x16   :  { %s421_s28 = smov [#allocation8]  }
  0x17   :  { %s40_s29 = sshll.u32 %s421_s28, 4  ;;  %s41_s29 = int_to_ptr.vmem [resolvable:$true] %s40_s29 }
  0x18   :  { %s381_s30 = scalar_lea.vmem %s41_s29, 2048  ;;  %p386_p11 = scmp.lt.s32.totalorder %s41_s29, %s41_s29 }
  0x19   :  { %p382_p10 = scmp.ne.s32.totalorder %s41_s29, %s381_s30  ;;  %p387_p12 = scmp.lt.s32.totalorder %s381_s30, %s381_s30 }
  0x1b   :  { %p388_p13 = por %p387_p12, %p386_p11 }
  0x1d   :  { %p389_p0 = pnand %p388_p13, %p382_p10 }
  0x1f   :  { %392 = shalt.err (!%p389_p0)
}
  0x20   :  { %s422_s1 = smov 128   ;;  %s423_s6 = smov 8  }
  0x21   :  { %46 = dma.hbm_to_vmem [thread:$0]  %s478_s3, 2048, %s41_s29, [#allocation7], %s422_s1, %s422_s1, %s423_s6  }
  0x22   :  { %413 = dma.done.wait [#allocation4], 128  }
  0x23   :  { %414 = vsyncadd [#allocation4], 4294967168 }
  0x24   :  { %415 = dma.done.wait [#allocation7], 2176  }
  0x25   :  { %416 = vsyncadd [#allocation7], 4294965120  ;;  %v424_v0 = vmov 0.0   ;;  %vm425_vm0 = vmmov 0   ;;  %vm75_vm1 = vcmask 1044480   ;;  %vm71_vm2 = vcmask 39936  }
  0x26   :  { %285 = vmatprep.subr.mxu0 %v424_v0  ;;  %287 = vmatprep.mubr.msk.f32.mxu0 %vm425_vm0, %v424_v0  ;;  %v63_v1 = vld [vmem:[#allocation6] sm:$0x1f]  ;;  %v62_v2 = vld [vmem:[#allocation3] sm:$0xff]  ;;  %v165_v5 = vld [vmem:[#allocation8 + $0x68] sm:$0xff]  ;;  %s426_s11 = smov [#allocation9]  }
  0x27   :  { %290 = vmatprep.subr.mxu1 %v424_v0  ;;  %322 = vmatprep.mubr.msk.f32.mxu1 %vm425_vm0, %v424_v0  ;;  %v167_v3 = vld [vmem:[#allocation8 + $0x78] sm:$0xff]  ;;  %v166_v4 = vld [vmem:[#allocation8 + $0x70] sm:$0xff]  ;;  %v164_v6 = vld [vmem:[#allocation8 + $0x60] sm:$0xff]  ;;  %s252_s12 = sshll.u32 %s426_s11, 4  ;;  %s253_s12 = int_to_ptr.vmem [resolvable:$true] %s252_s12 }
  0x28   :  { %286 = vmatpush3.msk.msra.mxu0 %vm75_vm1, %v63_v1  ;;  %291 = vmatpush3.msra.mxu1 %v167_v3  ;;  %v163_v7 = vld [vmem:[#allocation8 + $0x58] sm:$0xff]  ;;  %v162_v8 = vld [vmem:[#allocation8 + $0x50] sm:$0xff]  ;;  %v161_v9 = vld [vmem:[#allocation8 + $0x48] sm:$0xff]  ;;  %s393_s13 = scalar_lea.vmem %s253_s12, 128  ;;  %p398_p2 = scmp.lt.s32.totalorder %s253_s12, %s253_s12 }
  0x29   :  { %288 = vmatmul.mubr.msk.f32.vlgmr.msra.gmra.mxu0 %vm71_vm2, %v62_v2  ;;  %292 = vmatprep.subr.mxu1 %v424_v0  ;;  %v160_v10 = vld [vmem:[#allocation8 + $0x40] sm:$0xff]  ;;  %v159_v11 = vld [vmem:[#allocation8 + $0x38] sm:$0xff]  ;;  %v158_v12 = vld [vmem:[#allocation8 + $0x30] sm:$0xff]  ;;  %p394_p1 = scmp.ne.s32.totalorder %s253_s12, %s393_s13  ;;  %p399_p3 = scmp.lt.s32.totalorder %s393_s13, %s393_s13 }
  0x2a   :  { %293 = vmatpush3.msra.mxu1 %v166_v4  ;;  %v157_v13 = vld [vmem:[#allocation8 + $0x28] sm:$0xff]  ;;  %v156_v14 = vld [vmem:[#allocation8 + $0x20] sm:$0xff]  ;;  %v155_v15 = vld [vmem:[#allocation8 + $0x18] sm:$0xff] }
  0x2b   :  { %294 = vmatprep.subr.mxu1 %v424_v0  ;;  %v154_v16 = vld [vmem:[#allocation8 + $0x10] sm:$0xff]  ;;  %v153_v17 = vld [vmem:[#allocation8 + $0x8] sm:$0xff]  ;;  %v152_v18 = vld [vmem:[#allocation8] sm:$0xff]  ;;  %p400_p4 = por %p399_p3, %p398_p2 }
  0x2c   :  { %295 = vmatpush3.msra.mxu1 %v165_v5  ;;  %v262_v19 = vld [vmem:[%s477_s2] ss:$0 sm:$0xff] }
  0x2d   :  { %296 = vmatprep.subr.mxu1 %v424_v0  ;;  %v265_v24 = vld [vmem:[%s479_s4] ss:$0 sm:$0xff]  ;;  %p401_p5 = pnand %p400_p4, %p394_p1 }
  0x2e   :  { %297 = vmatpush3.msra.mxu1 %v164_v6 }
  0x2f   :  { %298 = vmatprep.subr.mxu1 %v424_v0 }
  0x30   :  { %299 = vmatpush3.msra.mxu1 %v163_v7 }
  0x31   :  { %300 = vmatprep.subr.mxu1 %v424_v0 }
  0x32   :  { %301 = vmatpush3.msra.mxu1 %v162_v8 }
  0x33   :  { %302 = vmatprep.subr.mxu1 %v424_v0 }
  0x34   :  { %303 = vmatpush3.msra.mxu1 %v161_v9 }
  0x35   :  { %304 = vmatprep.subr.mxu1 %v424_v0 }
  0x36   :  { %305 = vmatpush3.msra.mxu1 %v160_v10 }
  0x37   :  { %306 = vmatprep.subr.mxu1 %v424_v0 }
  0x38   :  { %307 = vmatpush3.msra.mxu1 %v159_v11 }
  0x39   :  { %308 = vmatprep.subr.mxu1 %v424_v0 }
  0x3a   :  { %309 = vmatpush3.msra.mxu1 %v158_v12 }
  0x3b   :  { %310 = vmatprep.subr.mxu1 %v424_v0 }
  0x3c   :  { %311 = vmatpush3.msra.mxu1 %v157_v13 }
  0x3d   :  { %312 = vmatprep.subr.mxu1 %v424_v0 }
  0x3e   :  { %313 = vmatpush3.msra.mxu1 %v156_v14 }
  0x3f   :  { %314 = vmatprep.subr.mxu1 %v424_v0 }
  0x40   :  { %315 = vmatpush3.msra.mxu1 %v155_v15 }
  0x41   :  { %316 = vmatprep.subr.mxu1 %v424_v0 }
  0x42   :  { %317 = vmatpush3.msra.mxu1 %v154_v16 }
  0x43   :  { %318 = vmatprep.subr.mxu1 %v424_v0 }
  0x44   :  { %319 = vmatpush3.msra.mxu1 %v153_v17 }
  0x45   :  { %320 = vmatprep.subr.mxu1 %v424_v0 }
  0x46   :  { %321 = vmatpush3.msra.mxu1 %v152_v18 }
  0xe9   :  { %v145_v20 = vpop.f32.mrf.mxu0 }
  0xea   :  { %v146_v21 = vadd.f32 %v262_v19, %v145_v20 }
  0xeb   :  { %v289_v22 = vpop.f32.mrf.mxu0 }
  0xec   :  { %v149_v23 = vmax.f32 %v146_v21, 0.0 }
  0xee   :  { %323 = vmatmul.mubr.f32.vlgmr.msra.gmra.mxu1 %v149_v23 }
 0x1ae   :  { %v241_v25 = vpop.f32.mrf.mxu1 }
 0x1af   :  { %v242_v26 = vadd.f32 %v265_v24, %v241_v25 }
 0x1b0   :  { %v324_v27 = vpop.f32.mrf.mxu1 }
 0x1b1   :  { %245 = vst [vmem:[#allocation9] sm:$0xff] %v242_v26 }
 0x1b2   :  { %404 = shalt.err (!%p401_p5)
}
 0x1b3   :  { %255 = dma.vmem_to_hbm [thread:$0]  %s253_s12, 128, %s480_s5, [#allocation5]  }
 0x1b4   :  { %417 = dma.done.wait [#allocation5], 128  }
 0x1b5   :  { %418 = vsyncadd [#allocation5], 4294967168 }
 0x1b6   :  { %259 = vsyncpa [#allocation4], 1 }
 0x1b7   :  { %260 = vsyncpa [#allocation7], 1 }
 0x1b8   :  { %261 = vsyncpa [#allocation5], 1 }

</bundles_post_ra>
